<compile_context>
chip_gen: v6e
topology: v6e:2x2x1
jax: 0.10.0
libtpu: 0.0.40
codegen_flags: <defaults>
</compile_context>

<pallas_src>
import functools

import jax
import jax.numpy as jnp
from jax.experimental import pallas as pl
from jax.experimental.pallas import tpu as pltpu


def _dcgan_conv_kernel(p_ref, w_ref, b_ref, gw_ref, gb_ref, o_ref,
                       *, C_out, G, N, eps, slope):
    """One grid step = one batch element.

    p_ref  : (1, K, N)      im2col patches, K = KH*KW*C_in, N = H_out*W_out (lanes)
    w_ref  : (C_out, K)     conv weight, tap-major K ordering
    b_ref  : (C_out, 1)     conv bias
    gw_ref : (C_out, 1)     GroupNorm gamma
    gb_ref : (C_out, 1)     GroupNorm beta
    o_ref  : (1, C_out, N)  output
    """
    Cg = C_out // G

    # ---- conv: single fused MXU matmul, accumulate in registers ----------
    conv = jnp.dot(w_ref[...], p_ref[0],
                   preferred_element_type=jnp.float32)            # (C_out, N)
    conv = conv + b_ref[...]                                       # bias bcast over lanes

    # ---- group-membership selection matrices (iota, no DMA, no int div) --
    gid_gc = jax.lax.broadcasted_iota(jnp.int32, (G, C_out), 0)
    cid_gc = jax.lax.broadcasted_iota(jnp.int32, (G, C_out), 1)
    lo_gc = gid_gc * Cg
    sel_gc = ((cid_gc >= lo_gc) & (cid_gc < lo_gc + Cg)).astype(jnp.float32)  # (G, C_out)

    cid_cg = jax.lax.broadcasted_iota(jnp.int32, (C_out, G), 0)
    gid_cg = jax.lax.broadcasted_iota(jnp.int32, (C_out, G), 1)
    lo_cg = gid_cg * Cg
    sel_cg = ((cid_cg >= lo_cg) & (cid_cg < lo_cg + Cg)).astype(jnp.float32)  # (C_out, G)

    n_per_group = float(Cg * N)

    # ---- GroupNorm(16) statistics -----------------------------------------
    ch_sum = jnp.sum(conv, axis=1, keepdims=True)                  # (C_out, 1)
    grp_mean = jnp.dot(sel_gc, ch_sum,
                       preferred_element_type=jnp.float32) / n_per_group      # (G, 1)
    ch_mean = jnp.dot(sel_cg, grp_mean,
                      preferred_element_type=jnp.float32)          # (C_out, 1)

    centered = conv - ch_mean                                      # (C_out, N)
    ch_sqsum = jnp.sum(centered * centered, axis=1, keepdims=True)  # (C_out, 1)
    grp_var = jnp.dot(sel_gc, ch_sqsum,
                      preferred_element_type=jnp.float32) / n_per_group       # (G, 1)
    grp_rstd = jax.lax.rsqrt(grp_var + eps)                        # (G, 1)
    ch_rstd = jnp.dot(sel_cg, grp_rstd,
                      preferred_element_type=jnp.float32)          # (C_out, 1)

    # ---- normalize, affine, LeakyReLU(0.2) --------------------------------
    y = centered * ch_rstd * gw_ref[...] + gb_ref[...]             # (C_out, N)
    y = jnp.where(y > 0, y, slope * y)
    o_ref[0] = y.astype(o_ref.dtype)


def dcgan_conv_forward(x, conv_w, conv_b, gn_w, gn_b, *, stride=1,
                       num_groups=16, eps=1e-5, slope=0.2):
    """Forward of dcgan_conv: Conv2d(3x3, stride, pad=1) + GroupNorm(16) + LeakyReLU(0.2).

    x      : (B, C_in, H, W)          NCHW
    conv_w : (C_out, C_in, KH, KW)    PyTorch Conv2d layout
    conv_b : (C_out,)
    gn_w   : (C_out,)  GroupNorm gamma
    gn_b   : (C_out,)  GroupNorm beta
    Returns (B, C_out, H_out, W_out) NCHW.
    """
    B, C_in, H, W = x.shape
    C_out, _, KH, KW = conv_w.shape
    assert C_out % num_groups == 0, "GroupNorm requires C_out divisible by num_groups"
    pad = 1
    H_out = (H + 2 * pad - KH) // stride + 1
    W_out = (W + 2 * pad - KW) // stride + 1
    N = H_out * W_out
    K = KH * KW * C_in

    # im2col in the XLA wrapper (layout glue): (B, K, N), spatial on the lane axis.
    xp = jnp.pad(x, ((0, 0), (0, 0), (pad, pad), (pad, pad)))
    taps = []
    for di in range(KH):
        for dj in range(KW):
            taps.append(xp[:, :,
                           di: di + stride * (H_out - 1) + 1: stride,
                           dj: dj + stride * (W_out - 1) + 1: stride])
    patches = jnp.stack(taps, axis=1).reshape(B, K, N)             # K = tap*C_in + c

    # Weight (C_out, C_in, KH, KW) -> (C_out, K) with matching tap-major K order.
    w2d = jnp.transpose(conv_w, (0, 2, 3, 1)).reshape(C_out, K)
    b2d = conv_b.reshape(C_out, 1)
    gw2d = gn_w.reshape(C_out, 1)
    gb2d = gn_b.reshape(C_out, 1)

    kernel = functools.partial(_dcgan_conv_kernel, C_out=C_out, G=num_groups,
                               N=N, eps=eps, slope=slope)

    out = pl.pallas_call(
        kernel,
        out_shape=jax.ShapeDtypeStruct((B, C_out, N), x.dtype),
        grid_spec=pltpu.PrefetchScalarGridSpec(
            num_scalar_prefetch=0,
            grid=(B,),
            in_specs=[
                pl.BlockSpec((1, K, N), lambda b: (b, 0, 0)),
                pl.BlockSpec((C_out, K), lambda b: (0, 0)),
                pl.BlockSpec((C_out, 1), lambda b: (0, 0)),
                pl.BlockSpec((C_out, 1), lambda b: (0, 0)),
                pl.BlockSpec((C_out, 1), lambda b: (0, 0)),
            ],
            out_specs=pl.BlockSpec((1, C_out, N), lambda b: (b, 0, 0)),
        ),
        compiler_params=pltpu.CompilerParams(
            dimension_semantics=("parallel",)),
    )(patches, w2d, b2d, gw2d, gb2d)

    # (B, C_out, N) -> (B, C_out, H_out, W_out): pure view in NCHW, no transpose.
    return out.reshape(B, C_out, H_out, W_out)


def _reference_forward(x, conv_w, conv_b, gn_w, gn_b, *, stride=1,
                       num_groups=16, eps=1e-5, slope=0.2):
    """Pure-JAX (XLA) reference mirroring the PyTorch module exactly."""
    y = jax.lax.conv_general_dilated(
        x, conv_w, window_strides=(stride, stride),
        padding=((1, 1), (1, 1)),
        dimension_numbers=("NCHW", "OIHW", "NCHW"))
    y = y + conv_b.reshape(1, -1, 1, 1)
    B, C, Ho, Wo = y.shape
    g = y.reshape(B, num_groups, C // num_groups, Ho, Wo)
    mean = jnp.mean(g, axis=(2, 3, 4), keepdims=True)
    var = jnp.var(g, axis=(2, 3, 4), keepdims=True)
    g = (g - mean) / jnp.sqrt(var + eps)
    y = g.reshape(B, C, Ho, Wo)
    y = y * gn_w.reshape(1, -1, 1, 1) + gn_b.reshape(1, -1, 1, 1)
    return jnp.where(y > 0, y, slope * y)


if __name__ == "__main__":
    # Small shapes consistent with the module: nin=4, nout=64 (divisible by
    # the 16 GroupNorm groups), 16x16 spatial, batch 2.
    B, C_in, H, W = 2, 4, 16, 16
    C_out, KH, KW = 64, 3, 3

    key = jax.random.PRNGKey(0)
    k_x, k_w, k_b, k_gw, k_gb = jax.random.split(key, 5)

    x = jax.random.normal(k_x, (B, C_in, H, W), dtype=jnp.float32)
    conv_w = 0.1 * jax.random.normal(k_w, (C_out, C_in, KH, KW), dtype=jnp.float32)
    conv_b = 0.1 * jax.random.normal(k_b, (C_out,), dtype=jnp.float32)
    gn_w = 1.0 + 0.1 * jax.random.normal(k_gw, (C_out,), dtype=jnp.float32)
    gn_b = 0.1 * jax.random.normal(k_gb, (C_out,), dtype=jnp.float32)

    for stride in (1, 2):
        out = dcgan_conv_forward(x, conv_w, conv_b, gn_w, gn_b, stride=stride)
        jax.block_until_ready(out)
        ref = _reference_forward(x, conv_w, conv_b, gn_w, gn_b, stride=stride)
        assert out.shape == ref.shape, (out.shape, ref.shape)
        assert jnp.allclose(out, ref, atol=1e-4, rtol=1e-4), (
            f"mismatch at stride={stride}: "
            f"max abs err = {float(jnp.max(jnp.abs(out - ref)))}")

    print("KERNEL_OK")
</pallas_src>

<mosaic_0001>
module attributes {stable_mosaic.version = 11 : i64} {
  func.func @_dcgan_conv_kernel(%arg0: i32, %arg1: memref<1x36x256xf32, #tpu.memory_space<vmem>>, %arg2: memref<64x36xf32, #tpu.memory_space<vmem>>, %arg3: memref<64x1xf32, #tpu.memory_space<vmem>>, %arg4: memref<64x1xf32, #tpu.memory_space<vmem>>, %arg5: memref<64x1xf32, #tpu.memory_space<vmem>>, %arg6: memref<1x64x256xf32, #tpu.memory_space<vmem>>) attributes {dimension_semantics = [#tpu.dimension_semantics<parallel>], iteration_bounds = array<i64: 2>, scalar_prefetch = 0 : i64, scratch_operands = 0 : i64, tpu.core_type = #tpu.core_type<tc>, window_params = [{transform_indices = @transform_0, window_bounds = array<i64: 1, 36, 256>}, {pipeline_mode = #tpu.pipeline_mode<synchronous>, transform_indices = @transform_1, window_bounds = array<i64: 64, 36>}, {pipeline_mode = #tpu.pipeline_mode<synchronous>, transform_indices = @transform_2, window_bounds = array<i64: 64, 1>}, {pipeline_mode = #tpu.pipeline_mode<synchronous>, transform_indices = @transform_3, window_bounds = array<i64: 64, 1>}, {pipeline_mode = #tpu.pipeline_mode<synchronous>, transform_indices = @transform_4, window_bounds = array<i64: 64, 1>}, {transform_indices = @transform_5, window_bounds = array<i64: 1, 64, 256>}]} {
    %c0 = arith.constant 0 : index
    %c0_0 = arith.constant 0 : index
    %0 = vector.load %arg2[%c0, %c0_0] : memref<64x36xf32, #tpu.memory_space<vmem>>, vector<64x36xf32>
    %c0_1 = arith.constant 0 : index
    %c0_2 = arith.constant 0 : index
    %c0_3 = arith.constant 0 : index
    %1 = vector.load %arg1[%c0_1, %c0_2, %c0_3] : memref<1x36x256xf32, #tpu.memory_space<vmem>>, vector<1x36x256xf32>
    %2 = vector.shape_cast %1 : vector<1x36x256xf32> to vector<36x256xf32>
    %cst = arith.constant dense<0.000000e+00> : vector<64x256xf32>
    %3 = tpu.matmul %0, %2, %cst {dimension_numbers = #tpu.dot_dimension_numbers<[1], [0], [0], [1], [0, 0, 1, 1], [], []>} : vector<64x36xf32>, vector<36x256xf32>, vector<64x256xf32> -> vector<64x256xf32>
    %c0_4 = arith.constant 0 : index
    %c0_5 = arith.constant 0 : index
    %4 = vector.load %arg3[%c0_4, %c0_5] : memref<64x1xf32, #tpu.memory_space<vmem>>, vector<64x1xf32>
    %5 = vector.broadcast %4 : vector<64x1xf32> to vector<64x256xf32>
    %6 = arith.addf %3, %5 : vector<64x256xf32>
    %7 = tpu.iota {dimensions = array<i32: 0>} : vector<16x64xi32>
    %8 = tpu.iota {dimensions = array<i32: 1>} : vector<16x64xi32>
    %c4_i32 = arith.constant 4 : i32
    %9 = vector.broadcast %c4_i32 : i32 to vector<16x64xi32>
    %10 = arith.muli %7, %9 : vector<16x64xi32>
    %11 = arith.cmpi sge, %8, %10 : vector<16x64xi32>
    %c4_i32_6 = arith.constant 4 : i32
    %12 = vector.broadcast %c4_i32_6 : i32 to vector<16x64xi32>
    %13 = arith.addi %10, %12 : vector<16x64xi32>
    %14 = arith.cmpi slt, %8, %13 : vector<16x64xi32>
    %15 = arith.andi %11, %14 : vector<16x64xi1>
    %16 = arith.extui %15 : vector<16x64xi1> to vector<16x64xi32>
    %17 = arith.sitofp %16 : vector<16x64xi32> to vector<16x64xf32>
    %18 = tpu.iota {dimensions = array<i32: 0>} : vector<64x16xi32>
    %19 = tpu.iota {dimensions = array<i32: 1>} : vector<64x16xi32>
    %c4_i32_7 = arith.constant 4 : i32
    %20 = vector.broadcast %c4_i32_7 : i32 to vector<64x16xi32>
    %21 = arith.muli %19, %20 : vector<64x16xi32>
    %22 = arith.cmpi sge, %18, %21 : vector<64x16xi32>
    %c4_i32_8 = arith.constant 4 : i32
    %23 = vector.broadcast %c4_i32_8 : i32 to vector<64x16xi32>
    %24 = arith.addi %21, %23 : vector<64x16xi32>
    %25 = arith.cmpi slt, %18, %24 : vector<64x16xi32>
    %26 = arith.andi %22, %25 : vector<64x16xi1>
    %27 = arith.extui %26 : vector<64x16xi1> to vector<64x16xi32>
    %28 = arith.sitofp %27 : vector<64x16xi32> to vector<64x16xf32>
    %cst_9 = arith.constant dense<0.000000e+00> : vector<64xf32>
    %29 = vector.multi_reduction <add>, %6, %cst_9 [1] : vector<64x256xf32> to vector<64xf32>
    %30 = vector.shape_cast %29 : vector<64xf32> to vector<64x1xf32>
    %cst_10 = arith.constant dense<0.000000e+00> : vector<16x1xf32>
    %31 = tpu.matmul %17, %30, %cst_10 {dimension_numbers = #tpu.dot_dimension_numbers<[1], [0], [0], [1], [0, 0, 1, 1], [], []>} : vector<16x64xf32>, vector<64x1xf32>, vector<16x1xf32> -> vector<16x1xf32>
    %cst_11 = arith.constant 1.024000e+03 : f32
    %32 = vector.broadcast %cst_11 : f32 to vector<16x1xf32>
    %33 = arith.divf %31, %32 : vector<16x1xf32>
    %cst_12 = arith.constant dense<0.000000e+00> : vector<64x1xf32>
    %34 = tpu.matmul %28, %33, %cst_12 {dimension_numbers = #tpu.dot_dimension_numbers<[1], [0], [0], [1], [0, 0, 1, 1], [], []>} : vector<64x16xf32>, vector<16x1xf32>, vector<64x1xf32> -> vector<64x1xf32>
    %35 = vector.broadcast %34 : vector<64x1xf32> to vector<64x256xf32>
    %36 = arith.subf %6, %35 : vector<64x256xf32>
    %37 = arith.mulf %36, %36 : vector<64x256xf32>
    %cst_13 = arith.constant dense<0.000000e+00> : vector<64xf32>
    %38 = vector.multi_reduction <add>, %37, %cst_13 [1] : vector<64x256xf32> to vector<64xf32>
    %39 = vector.shape_cast %38 : vector<64xf32> to vector<64x1xf32>
    %cst_14 = arith.constant dense<0.000000e+00> : vector<16x1xf32>
    %40 = tpu.matmul %17, %39, %cst_14 {dimension_numbers = #tpu.dot_dimension_numbers<[1], [0], [0], [1], [0, 0, 1, 1], [], []>} : vector<16x64xf32>, vector<64x1xf32>, vector<16x1xf32> -> vector<16x1xf32>
    %cst_15 = arith.constant 1.024000e+03 : f32
    %41 = vector.broadcast %cst_15 : f32 to vector<16x1xf32>
    %42 = arith.divf %40, %41 : vector<16x1xf32>
    %cst_16 = arith.constant 9.99999974E-6 : f32
    %43 = vector.broadcast %cst_16 : f32 to vector<16x1xf32>
    %44 = arith.addf %42, %43 : vector<16x1xf32>
    %45 = math.rsqrt %44 : vector<16x1xf32>
    %cst_17 = arith.constant dense<0.000000e+00> : vector<64x1xf32>
    %46 = tpu.matmul %28, %45, %cst_17 {dimension_numbers = #tpu.dot_dimension_numbers<[1], [0], [0], [1], [0, 0, 1, 1], [], []>} : vector<64x16xf32>, vector<16x1xf32>, vector<64x1xf32> -> vector<64x1xf32>
    %47 = vector.broadcast %46 : vector<64x1xf32> to vector<64x256xf32>
    %48 = arith.mulf %36, %47 : vector<64x256xf32>
    %c0_18 = arith.constant 0 : index
    %c0_19 = arith.constant 0 : index
    %49 = vector.load %arg4[%c0_18, %c0_19] : memref<64x1xf32, #tpu.memory_space<vmem>>, vector<64x1xf32>
    %50 = vector.broadcast %49 : vector<64x1xf32> to vector<64x256xf32>
    %51 = arith.mulf %48, %50 : vector<64x256xf32>
    %c0_20 = arith.constant 0 : index
    %c0_21 = arith.constant 0 : index
    %52 = vector.load %arg5[%c0_20, %c0_21] : memref<64x1xf32, #tpu.memory_space<vmem>>, vector<64x1xf32>
    %53 = vector.broadcast %52 : vector<64x1xf32> to vector<64x256xf32>
    %54 = arith.addf %51, %53 : vector<64x256xf32>
    %cst_22 = arith.constant 0.000000e+00 : f32
    %55 = vector.broadcast %cst_22 : f32 to vector<64x256xf32>
    %56 = arith.cmpf ogt, %54, %55 : vector<64x256xf32>
    %cst_23 = arith.constant 2.000000e-01 : f32
    %57 = vector.broadcast %cst_23 : f32 to vector<64x256xf32>
    %58 = arith.mulf %57, %54 : vector<64x256xf32>
    %59 = arith.select %56, %54, %58 : vector<64x256xi1>, vector<64x256xf32>
    %c0_24 = arith.constant 0 : index
    %c0_25 = arith.constant 0 : index
    %c0_26 = arith.constant 0 : index
    %60 = vector.load %arg6[%c0_24, %c0_25, %c0_26] : memref<1x64x256xf32, #tpu.memory_space<vmem>>, vector<1x64x256xf32>
    %61 = vector.shape_cast %60 : vector<1x64x256xf32> to vector<64x256xf32>
    %62 = vector.shape_cast %59 : vector<64x256xf32> to vector<1x64x256xf32>
    tpu.vector_store %arg6[%c0_24, %c0_25, %c0_26], %62 {strides = array<i32>} : memref<1x64x256xf32, #tpu.memory_space<vmem>>, vector<1x64x256xf32>,
    return
  }
  func.func @transform_0(%arg0: i32) -> (i32, i32, i32) {
    %c0_i32 = arith.constant 0 : i32
    %c0_i32_0 = arith.constant 0 : i32
    %c0_i32_1 = arith.constant 0 : i32
    return %arg0, %c0_i32, %c0_i32_0 : i32, i32, i32
  }
  func.func @transform_1(%arg0: i32) -> (i32, i32) {
    %c0_i32 = arith.constant 0 : i32
    %c0_i32_0 = arith.constant 0 : i32
    %c0_i32_1 = arith.constant 0 : i32
    return %c0_i32, %c0_i32_0 : i32, i32
  }
  func.func @transform_2(%arg0: i32) -> (i32, i32) {
    %c0_i32 = arith.constant 0 : i32
    %c0_i32_0 = arith.constant 0 : i32
    %c0_i32_1 = arith.constant 0 : i32
    return %c0_i32, %c0_i32_0 : i32, i32
  }
  func.func @transform_3(%arg0: i32) -> (i32, i32) {
    %c0_i32 = arith.constant 0 : i32
    %c0_i32_0 = arith.constant 0 : i32
    %c0_i32_1 = arith.constant 0 : i32
    return %c0_i32, %c0_i32_0 : i32, i32
  }
  func.func @transform_4(%arg0: i32) -> (i32, i32) {
    %c0_i32 = arith.constant 0 : i32
    %c0_i32_0 = arith.constant 0 : i32
    %c0_i32_1 = arith.constant 0 : i32
    return %c0_i32, %c0_i32_0 : i32, i32
  }
  func.func @transform_5(%arg0: i32) -> (i32, i32, i32) {
    %c0_i32 = arith.constant 0 : i32
    %c0_i32_0 = arith.constant 0 : i32
    %c0_i32_1 = arith.constant 0 : i32
    return %arg0, %c0_i32, %c0_i32_0 : i32, i32, i32
  }
}

</mosaic_0001>

<bundles_post_ra>
// kernel: tpu_custom_call.1
= control target key start
LH: loop header
LB: loop body
LE: loop exit
PB: predicated region body
PF: predicated region fallthrough
CT: control target
= control target key end

     0   :  { %10 = vsyncpa [#allocation3], 0  ;;  %s2176_s0 = inlined_call_operand.vmem [shape: f32[2,36,256], index: 0, kind: input, shape index: {}]   ;;  %s2177_s1 = inlined_call_operand.vmem [shape: f32[64,36], index: 1, kind: input, shape index: {}]   ;;  %s2178_s2 = inlined_call_operand.vmem [shape: f32[64,1], index: 2, kind: input, shape index: {}]   ;;  %s2179_s3 = inlined_call_operand.vmem [shape: f32[64,1], index: 3, kind: input, shape index: {}]   ;;  %s2180_s4 = inlined_call_operand.vmem [shape: f32[64,1], index: 4, kind: input, shape index: {}]   ;;  %s2181_s5 = inlined_call_operand.hbm [shape: f32[2,64,256], index: 5, kind: output, shape index: {}]  }
   0x1   :  { %12 = vsyncpa [#allocation3 + $0x1], 0  ;;  %s1655_s18 = smov 0   ;;  %s1657_s19 = smov 0  }
   0x2   :  { %s1659_s20 = smov 0   ;;  %s1661_s21 = smov 0  }
   0x3 LB: > { %s1676_s22 = sadd.s32 4294967295, %s1618_s21   ;;  %s1346_s23 = sadd.s32 4294967294, %s1618_s21   ;;  %s1618_s21 = sphi %s1661_s21, %s2201_s21   ;;  %s1614_s20 = sphi %s1659_s20, %s2200_s20   ;;  %s1610_s19 = sphi %s1657_s19, %s2199_s19   ;;  %s1606_s18 = sphi %s1655_s18, %s2198_s18  }
   0x4   : > { %s1680_s24 = sadd.s32 1, %s1618_s21   ;;  %s135_s25 = sadd.s32 1, %s1614_s20 }
   0x5   : > { %s132_s26 = ssub.s32 %s1618_s21, %s1680_s24  ;;  %p145_p0 = scmp.ne.s32.totalorder %s1614_s20, %s1610_s19 }
   0x6   : > { %p133_p1 = scmp.eq.s32.totalorder %s132_s26, 0  ;;  %p146_p2 = scmp.eq.s32.totalorder %s1676_s22, 1 }
   0x7   : > { %p151_p3 = scmp.ne.s32.totalorder %s1610_s19, %s1606_s18  ;;  %p152_p4 = scmp.eq.s32.totalorder %s1346_s23, 1 }
   0x8   : > { %s1691_s27 = scalar_select %p133_p1, %s1614_s20, %s135_s25  }
   0x9   : > { %p1693_p5 = por %p146_p2, %p145_p0  ;;  %p1697_p6 = por %p152_p4, %p151_p3 }
   0xa   : > { %p1349_p7 = scmp.ge.s32.totalorder %s1618_s21, 1  ;;  %p190_p8 = scmp.lt.s32.totalorder %s1618_s21, 3 }
   0xc   : > { %p191_p9 = pnand %p1349_p7, %p190_p8 }
   0xd   : > { %p218_p10 = scmp.lt.s32.totalorder (!%p191_p9), %s1676_s22, 1  ;;  %s1397_s13 = sshll.u32 (!%p191_p9), %s1676_s22, 11 }
   0xe   : > { %194 = sbr.rel (%p191_p9) target bundleno = 1685 (0x695), region = 40  ;;  %s2128_s16 = scalar_lea.hbm (!%p191_p9), %s2181_s5, %s1397_s13 }
   0xf   : > { %s1622_s25 = smov (!%p191_p9), [#allocation2]  }
  0x10   : > { %s1562_s26 = sshll.u32 (!%p191_p9), %s1622_s25, 4  ;;  %s1563_s26 = int_to_ptr.vmem [resolvable:$false] %s1562_s26 }
  0x13   : > { %v1620_v0 = vmov 0.0   ;;  %s219_s30 = scalar_select %p218_p10, %s1676_s22, 1  ;;  %v1621_v1 = vmov 0   ;;  %v246_v2 = vld [vmem:[%s2178_s2 + $0x28] sm:$0xff]  ;;  %v248_v3 = vld [vmem:[%s2178_s2 + $0x38] sm:$0xff]  ;;  %vm314_vm0 = vcmask 1043456  }
  0x14   : > { %385 = vmatprep.mubr.f32.mxu0 %v1620_v0  ;;  %1553 = vset.pattern.permute.xlu1 %v1621_v1  ;;  %v245_v4 = vld [vmem:[%s2178_s2 + $0x20] sm:$0xff]  ;;  %v247_v5 = vld [vmem:[%s2178_s2 + $0x30] sm:$0xff]  ;;  %v244_v13 = vld [vmem:[%s2178_s2 + $0x18] sm:$0xff]  ;;  %vm289_vm1 = vcmask 293888   ;;  %vm525_vm5 = vcmask 523264   ;;  %vm610_vm14 = vcmask 130048  }
  0x15   : > { %1552 = vset.pattern.permute.xlu0 %v1621_v1  ;;  %s1508_s10 = smul.u32 80, %s219_s30  ;;  %276 = vperm.xlu1 %1553, %v246_v2   ;;  %v243_v11 = vld [vmem:[%s2178_s2 + $0x10] sm:$0xff]  ;;  %v241_v17 = vld [vmem:[%s2178_s2] sm:$0xff]  ;;  %v242_v19 = vld [vmem:[%s2178_s2 + $0x8] sm:$0xff]  ;;  %s1564_s30 = scalar_lea.vmem %s1563_s26, 4096 }
  0x16   : > { %286 = vperm.xlu0 %1552, %v248_v3   ;;  %v223_v20 = vld [vmem:[%s2177_s1] sm:$0xff]  ;;  %v224_v21 = vld [vmem:[%s2177_s1 + $0x8] sm:$0xff]  ;;  %v225_v22 = vld [vmem:[%s2177_s1 + $0x10] sm:$0xff] }
  0x17   : > { %s222_s15 = scalar_lea.vmem %s2176_s0, %s1508_s10  ;;  %v226_v23 = vld [vmem:[%s2177_s1 + $0x18] sm:$0xff]  ;;  %v227_v24 = vld [vmem:[%s2177_s1 + $0x20] sm:$0xff]  ;;  %v228_v25 = vld [vmem:[%s2177_s1 + $0x28] sm:$0xff]  ;;  %s215_s10 = sand.u32 1, %s1610_s19  }
  0x18   : > { %v240_v6 = vld [vmem:[%s222_s15 + $0x48] sm:$0xf]  ;;  %v239_v7 = vld [vmem:[%s222_s15 + $0x40] sm:$0xf]  ;;  %v238_v8 = vld [vmem:[%s222_s15 + $0x38] sm:$0xff]  ;;  %s1350_s11 = sshll.u32 %s215_s10, 7 }
  0x19   : > { %1352 = vmatprep.subr.msk.mxu0 %vm314_vm0, %v240_v6  ;;  %v237_v9 = vld [vmem:[%s222_s15 + $0x30] sm:$0xff]  ;;  %271 = vperm.xlu1 %1553, %v245_v4   ;;  %v236_v10 = vld [vmem:[%s222_s15 + $0x28] sm:$0xff]  ;;  %v235_v12 = vld [vmem:[%s222_s15 + $0x20] sm:$0xff]  ;;  %s2089_s12 = scalar_lea.vmem [#allocation2], %s1350_s11  ;;  %s2136_s17 = scalar_lea.sflag [#allocation3], %s215_s10 }
  0x1a   : > { %1353 = vmatpush1.msk.msra.mxu0 %vm314_vm0, %v239_v7  ;;  %281 = vperm.xlu0 %1552, %v247_v5   ;;  %v234_v14 = vld [vmem:[%s222_s15 + $0x18] sm:$0xff]  ;;  %v233_v15 = vld [vmem:[%s222_s15 + $0x10] sm:$0xff]  ;;  %v232_v16 = vld [vmem:[%s222_s15 + $0x8] sm:$0xff]  ;;  %s1284_s14 = sshll.u32 %s2089_s12, 4  ;;  %s2130_s14 = int_to_ptr.vmem [resolvable:$true] %s1284_s14 }
  0x1b   : > { %345 = vmatprep.subr.mxu0 %v238_v8  ;;  %v231_v18 = vld [vmem:[%s222_s15] sm:$0xff]  ;;  %v229_v26 = vld [vmem:[%s2177_s1 + $0x30] sm:$0xff]  ;;  %v230_v27 = vld [vmem:[%s2177_s1 + $0x38] sm:$0xff]  ;;  %s1558_s23 = scalar_lea.vmem %s2130_s14, 2048  ;;  %p1565_p0 = scmp.lt.s32.totalorder %s2130_s14, %s1563_s26 }
  0x1c   : > { %346 = vmatpush1.msra.mxu0 %v237_v9  ;;  %p1559_p11 = scmp.ne.s32.totalorder %s2130_s14, %s1558_s23  ;;  %p1566_p1 = scmp.lt.s32.totalorder %s1564_s30, %s1558_s23 }
  0x1d   : > { %347 = vmatprep.subr.mxu0 %v236_v10  ;;  %261 = vperm.xlu1 %1553, %v243_v11  }
  0x1e   : > { %348 = vmatpush1.msra.mxu0 %v235_v12  ;;  %266 = vperm.xlu0 %1552, %v244_v13   ;;  %v434_v13 = vlaneseq  ;;  %p1560_p12 = pnand %p1559_p11, %p1693_p5  ;;  %p1567_p2 = por %p1566_p1, %p1565_p0 }
  0x1f   : > { %349 = vmatprep.subr.mxu0 %v234_v14 }
  0x20   : > { %350 = vmatpush1.msra.mxu0 %v233_v15  ;;  %v1820_v14 = vshrl.u32 %v434_v13, 7  ;;  %p1561_p13 = pneg %p1560_p12 }
  0x21   : > { %351 = vmatprep.subr.mxu0 %v232_v16  ;;  %251 = vperm.xlu1 %1553, %v241_v17   ;;  %v438_v16 = vand.u32 127, %v434_v13 }
  0x22   : > { %352 = vmatpush1.msra.mxu0 %v231_v18  ;;  %256 = vperm.xlu0 %1552, %v242_v19   ;;  %v439_v15 = vmul.u32 4, %v1820_v14  ;;  %v436_v19 = vadd.s32 8, %v1820_v14  ;;  %p1568_p3 = pnand %p1567_p2, %p1561_p13 }
  0x23   : > { %1354 = vmatmul.mubr.msk.f32.vlgmr.msra.gmra.mxu0 %vm289_vm1, %v223_v20 }
  0x24   : > { %391 = vmatprep.mubr.f32.mxu0 %v1620_v0  ;;  %v443_v17 = vadd.s32 4, %v439_v15  ;;  %vm441_vm2 = vcmp.ge.s32.totalorder %v438_v16, %v439_v15 }
  0x26   : > { %vm445_vm3 = vcmp.lt.s32.totalorder %v438_v16, %v443_v17 }
  0x27   : > { %1355 = vmatmul.mubr.msk.f32.gmra.mxu0 %vm289_vm1, %v224_v21  ;;  %vm447_vm4 = vmand %vm441_vm2, %vm445_vm3 }
  0x28   : > { %397 = vmatprep.mubr.f32.mxu0 %v1620_v0  ;;  %v1824_v18 = vsel %vm447_vm4, 1.0, %v1620_v0 }
  0x2b   : > { %1356 = vmatmul.mubr.msk.f32.gmra.mxu0 %vm289_vm1, %v225_v22  ;;  %v440_v22 = vmul.u32 4, %v436_v19 }
  0x2c   : > { %403 = vmatprep.mubr.f32.mxu0 %v1620_v0 }
  0x2d   : > { %vm442_vm6 = vcmp.ge.s32.totalorder %v438_v16, %v440_v22 }
  0x2f   : > { %1357 = vmatmul.mubr.msk.f32.gmra.mxu0 %vm289_vm1, %v226_v23 }
  0x30   : > { %409 = vmatprep.mubr.f32.mxu0 %v1620_v0 }
  0x33   : > { %1358 = vmatmul.mubr.msk.f32.gmra.mxu0 %vm289_vm1, %v227_v24  ;;  %v444_v24 = vadd.s32 4, %v440_v22 }
  0x34   : > { %415 = vmatprep.mubr.f32.mxu0 %v1620_v0 }
  0x35   : > { %vm446_vm7 = vcmp.lt.s32.totalorder %v438_v16, %v444_v24 }
  0x36   : > { %vm448_vm8 = vmand %vm442_vm6, %vm446_vm7 }
  0x37   : > { %1359 = vmatmul.mubr.msk.f32.gmra.mxu0 %vm289_vm1, %v228_v25 }
  0x38   : > { %421 = vmatprep.mubr.f32.mxu0 %v1620_v0 }
  0x3b   : > { %1360 = vmatmul.mubr.msk.f32.gmra.mxu0 %vm289_vm1, %v229_v26 }
  0x3c   : > { %427 = vmatprep.mubr.f32.mxu0 %v1620_v0 }
  0x3f   : > { %1361 = vmatmul.mubr.msk.f32.gmra.mxu0 %vm289_vm1, %v230_v27 }
  0x40   : > { %1454 = vmatprep.mubr.msk.f32.mxu0 %vm525_vm5, %v1824_v18 }
  0x90   : > { %v277_v43 = vpop.permute.xlu1 %276 }
  0x91   : > { %v287_v35 = vpop.permute.xlu0 %286 }
  0x94   : > { %v272_v55 = vpop.permute.xlu1 %271 }
  0x95   : > { %v282_v39 = vpop.permute.xlu0 %281 }
  0x98   : > { %v262_v3 = vpop.permute.xlu1 %261 }
  0x99   : > { %v267_v44 = vpop.permute.xlu0 %266 }
  0x9c   : > { %v252_v8 = vpop.permute.xlu1 %251 }
  0x9d   : > { %v257_v56 = vpop.permute.xlu0 %256 }
  0xe3   : > { %v387_v28 = vpop.f32.mrf.mxu0 }
  0xe4   : > { %v1816_v11 = vadd.f32 %v387_v28, %v252_v8 }
  0xe5   : > { %v389_v29 = vpop.f32.mrf.mxu0 }
  0xe6   : > { %v1812_v9 = vadd.f32 %v389_v29, %v252_v8 }
  0xe7   : > { %v393_v30 = vpop.f32.mrf.mxu0 }
  0xe8   : > { %v1794_v61 = vadd.f32 %v393_v30, %v257_v56  ;;  %v501_v12 = vadd.f32 %v1812_v9, %v1816_v11  ;;  %v1830_v30 = vsel %vm448_vm8, 1.0, %v1620_v0 }
  0xe9   : > { %v395_v31 = vpop.f32.mrf.mxu0 }
  0xea   : > { %v1786_v57 = vadd.f32 %v395_v31, %v257_v56  ;;  %v459_v31 = vmul.u32 4, %v438_v16 }
  0xeb   : > { %v399_v32 = vpop.f32.mrf.mxu0 }
  0xec   : > { %v504_v2 = vadd.f32 %v1786_v57, %v1794_v61  ;;  %v1810_v7 = vadd.f32 %v399_v32, %v262_v3  ;;  %v468_v32 = vadd.s32 4, %v459_v31  ;;  %vm460_vm9 = vcmp.ge.s32.totalorder %v1820_v14, %v459_v31 }
  0xed   : > { %v401_v33 = vpop.f32.mrf.mxu0  ;;  %vm461_vm12 = vcmp.ge.s32.totalorder %v436_v19, %v459_v31 }
  0xee   : > { %v1806_v5 = vadd.f32 %v401_v33, %v262_v3  ;;  %vm469_vm10 = vcmp.lt.s32.totalorder %v1820_v14, %v468_v32  ;;  %vm470_vm13 = vcmp.lt.s32.totalorder %v436_v19, %v468_v32 }
  0xef   : > { %v405_v34 = vpop.f32.mrf.mxu0  ;;  %vm477_vm11 = vmand %vm460_vm9, %vm469_vm10 }
  0xf0   : > { %v1780_v52 = vadd.f32 %v405_v34, %v267_v44  ;;  %v507_v10 = vadd.f32 %v1806_v5, %v1810_v7  ;;  %v1837_v33 = vsel %vm477_vm11, 1.0, %v1620_v0  ;;  %vm1839_vm15 = vmand %vm461_vm12, %vm470_vm13 }
  0xf1   : > { %v407_v36 = vpop.f32.mrf.mxu0  ;;  %1461 = vmatprep.mubr.msk.f32.mxu1 %vm610_vm14, %v1837_v33 }
  0xf2   : > { %v1776_v49 = vadd.f32 %v407_v36, %v267_v44  ;;  %v454_v36 = vadd.s32 24, %v1820_v14  ;;  %v458_v44 = vadd.s32 56, %v1820_v14 }
  0xf3   : > { %v411_v37 = vpop.f32.mrf.mxu0 }
  0xf4   : > { %v510_v60 = vadd.f32 %v1776_v49, %v1780_v52  ;;  %v1804_v4 = vadd.f32 %v411_v37, %v272_v55  ;;  %vm463_vm3 = vcmp.ge.s32.totalorder %v454_v36, %v459_v31  ;;  %vm472_vm4 = vcmp.lt.s32.totalorder %v454_v36, %v468_v32 }
  0xf5   : > { %v413_v38 = vpop.f32.mrf.mxu0  ;;  %vm1851_vm6 = vmand %vm463_vm3, %vm472_vm4  ;;  %vm467_vm3 = vcmp.ge.s32.totalorder %v458_v44, %v459_v31  ;;  %vm476_vm4 = vcmp.lt.s32.totalorder %v458_v44, %v468_v32 }
  0xf6   : > { %v1798_v63 = vadd.f32 %v413_v38, %v272_v55 }
  0xf7   : > { %v417_v40 = vpop.f32.mrf.mxu0 }
  0xf8   : > { %v1796_v62 = vadd.f32 %v417_v40, %v277_v43  ;;  %v513_v6 = vadd.f32 %v1798_v63, %v1804_v4  ;;  %v456_v40 = vadd.s32 40, %v1820_v14 }
  0xf9   : > { %v419_v41 = vpop.f32.mrf.mxu0 }
  0xfa   : > { %v1788_v58 = vadd.f32 %v419_v41, %v277_v43  ;;  %vm465_vm10 = vcmp.ge.s32.totalorder %v456_v40, %v459_v31  ;;  %vm474_vm11 = vcmp.lt.s32.totalorder %v456_v40, %v468_v32  ;;  %v457_v43 = vadd.s32 48, %v1820_v14 }
  0xfb   : > { %v423_v42 = vpop.f32.mrf.mxu0  ;;  %vm1861_vm12 = vmand %vm465_vm10, %vm474_vm11 }
  0xfc   : > { %v1772_v46 = vadd.f32 %v423_v42, %v282_v39  ;;  %v516_v1 = vadd.f32 %v1788_v58, %v1796_v62  ;;  %vm466_vm13 = vcmp.ge.s32.totalorder %v457_v43, %v459_v31  ;;  %v1906_v3 = vsel %vm1861_vm12, 1.0, %v1620_v0 }
  0xfd   : > { %v425_v45 = vpop.f32.mrf.mxu0 }
  0xfe   : > { %v1774_v47 = vadd.f32 %v425_v45, %v282_v39  ;;  %v455_v39 = vadd.s32 32, %v1820_v14 }
  0xff   : > { %v429_v48 = vpop.f32.mrf.mxu0 }
 0x100   : > { %v519_v50 = vadd.f32 %v1774_v47, %v1772_v46  ;;  %v1782_v53 = vadd.f32 %v429_v48, %v287_v35  ;;  %vm464_vm7 = vcmp.ge.s32.totalorder %v455_v39, %v459_v31  ;;  %vm473_vm8 = vcmp.lt.s32.totalorder %v455_v39, %v468_v32 }
 0x101   : > { %v431_v51 = vpop.f32.mrf.mxu0  ;;  %vm1857_vm9 = vmand %vm464_vm7, %vm473_vm8 }
 0x102   : > { %v1784_v54 = vadd.f32 %v431_v51, %v287_v35  ;;  %520 = vadd.xlane.f32.xlu1 %v519_v50  ;;  %v453_v35 = vadd.s32 16, %v1820_v14  ;;  %vm1871_vm7 = vmand %vm467_vm3, %vm476_vm4 }
 0x103   : > { %v1920_v8 = vsel %vm1871_vm7, 1.0, %v1620_v0 }
 0x104   : > { %v522_v59 = vadd.f32 %v1784_v54, %v1782_v53  ;;  %vm462_vm0 = vcmp.ge.s32.totalorder %v453_v35, %v459_v31  ;;  %vm471_vm1 = vcmp.lt.s32.totalorder %v453_v35, %v468_v32 }
 0x105   : > { %vm1847_vm2 = vmand %vm462_vm0, %vm471_vm1  ;;  %vm475_vm0 = vcmp.lt.s32.totalorder %v457_v43, %v468_v32 }
 0x106   : > { %523 = vadd.xlane.f32.xlu0 %v522_v59  ;;  %511 = vadd.xlane.f32.xlu1 %v510_v60  ;;  %vm1867_vm1 = vmand %vm466_vm13, %vm475_vm0  ;;  %v1878_v59 = vsel %vm1839_vm15, 1.0, %v1620_v0  ;;  %v1883_v60 = vsel %vm1847_vm2, 1.0, %v1620_v0 }
 0x10a   : > { %517 = vadd.xlane.f32.xlu0 %v516_v1  ;;  %505 = vadd.xlane.f32.xlu1 %v504_v2  ;;  %v1892_v1 = vsel %vm1851_vm6, 1.0, %v1620_v0  ;;  %v1897_v2 = vsel %vm1857_vm9, 1.0, %v1620_v0 }
 0x10e   : > { %514 = vadd.xlane.f32.xlu0 %v513_v6  ;;  %v1911_v6 = vsel %vm1867_vm1, 1.0, %v1620_v0 }
 0x112   : > { %508 = vadd.xlane.f32.xlu0 %v507_v10 }
 0x116   : > { %502 = vadd.xlane.f32.xlu0 %v501_v12 }
 0x18b   : > { %v521_v21 = vpop.xlane.xlu1 %520 }
 0x18f   : > { %v524_v20 = vpop.xlane.xlu0 %523  ;;  %v512_v25 = vpop.xlane.xlu1 %511 }
 0x190   : > { %1438 = vmatprep.subr.mxu0 %v524_v20 }
 0x191   : > { %1439 = vmatpush3.msra.mxu0 %v524_v20 }
 0x192   : > { %1440 = vmatprep.subr.mxu0 %v521_v21 }
 0x193   : > { %1441 = vmatpush3.msra.mxu0 %v521_v21  ;;  %v518_v23 = vpop.xlane.xlu0 %517  ;;  %v506_v28 = vpop.xlane.xlu1 %505 }
 0x194   : > { %1442 = vmatprep.subr.mxu0 %v518_v23 }
 0x195   : > { %1443 = vmatpush3.msra.mxu0 %v518_v23 }
 0x197   : > { %v515_v26 = vpop.xlane.xlu0 %514 }
 0x198   : > { %1444 = vmatprep.subr.mxu0 %v515_v26 }
 0x199   : > { %1445 = vmatpush3.msra.mxu0 %v515_v26 }
 0x19a   : > { %1446 = vmatprep.subr.mxu0 %v512_v25 }
 0x19b   : > { %1447 = vmatpush3.msra.mxu0 %v512_v25  ;;  %v509_v27 = vpop.xlane.xlu0 %508 }
 0x19c   : > { %1448 = vmatprep.subr.mxu0 %v509_v27 }
 0x19d   : > { %1449 = vmatpush3.msra.mxu0 %v509_v27 }
 0x19e   : > { %1450 = vmatprep.subr.mxu0 %v506_v28 }
 0x19f   : > { %1451 = vmatpush3.msra.mxu0 %v506_v28  ;;  %v503_v29 = vpop.xlane.xlu0 %502 }
 0x1a0   : > { %1452 = vmatprep.subr.mxu0 %v503_v29 }
 0x1a1   : > { %1453 = vmatpush3.msra.mxu0 %v503_v29 }
 0x1a2   : > { %1455 = vmatmul.mubr.msk.f32.vlgmr.msra.gmra.mxu0 %vm525_vm5, %v1830_v30 }
 0x262   : > { %v1456_v50 = vpop.f32.mrf.mxu0 }
 0x263   : > { %v609_v51 = vmul.f32 0.0009765625, %v1456_v50 }
 0x264   : > { %v598_v55 = vpop.f32.mrf.mxu0 }
 0x265   : > { %v608_v56 = vmul.f32 0.0009765625, %v598_v55  ;;  %1457 = vmatprep.subr.mxu1 %v609_v51 }
 0x266   : > { %1458 = vmatpush3.msra.mxu1 %v609_v51 }
 0x267   : > { %1459 = vmatprep.subr.mxu1 %v608_v56 }
 0x268   : > { %1460 = vmatpush3.msra.mxu1 %v608_v56 }
 0x269   : > { %1462 = vmatmul.mubr.msk.f32.vlgmr.msra.gmra.mxu1 %vm610_vm14, %v1878_v59 }
 0x26a   : > { %1464 = vmatprep.mubr.msk.f32.mxu1 %vm610_vm14, %v1883_v60 }
 0x26d   : > { %1465 = vmatmul.mubr.msk.f32.gmra.mxu1 %vm610_vm14, %v1892_v1 }
 0x26e   : > { %1467 = vmatprep.mubr.msk.f32.mxu1 %vm610_vm14, %v1897_v2 }
 0x271   : > { %1468 = vmatmul.mubr.msk.f32.gmra.mxu1 %vm610_vm14, %v1906_v3 }
 0x272   : > { %1470 = vmatprep.mubr.msk.f32.mxu1 %vm610_vm14, %v1911_v6 }
 0x275   : > { %1471 = vmatmul.mubr.msk.f32.gmra.mxu1 %vm610_vm14, %v1920_v8 }
 0x276   : > { %1489 = vmatprep.mubr.msk.f32.mxu1 %vm525_vm5, %v1824_v18 }
 0x329   : > { %v1463_v10 = vpop.f32.mrf.mxu1 }
 0x32b   : > { %v701_v12 = vpop.f32.mrf.mxu1 }
 0x32d   : > { %v1466_v13 = vpop.f32.mrf.mxu1 }
 0x32f   : > { %v711_v14 = vpop.f32.mrf.mxu1 }
 0x331   : > { %v1469_v15 = vpop.f32.mrf.mxu1 }
 0x333   : > { %v721_v16 = vpop.f32.mrf.mxu1 }
 0x335   : > { %v1472_v17 = vpop.f32.mrf.mxu1 }
 0x336   : > { %777 = vperm.xlu1 %1553, %v1472_v17   ;;  %v1080_v17 = vld [vmem:[%s2179_s3 + $0x10] sm:$0xff] }
 0x337   : > { %v731_v19 = vpop.f32.mrf.mxu1 }
 0x338   : > { %772 = vperm.xlu0 %1552, %v731_v19   ;;  %v1143_v19 = vld [vmem:[%s2180_s4 + $0x8] sm:$0xff] }
 0x33a   : > { %767 = vperm.xlu1 %1553, %v1469_v15   ;;  %v1078_v15 = vld [vmem:[%s2179_s3] sm:$0xff] }
 0x33c   : > { %757 = vperm.xlu0 %1552, %v1466_v13  }
 0x33e   : > { %762 = vperm.xlu1 %1553, %v721_v16   ;;  %v1085_v16 = vld [vmem:[%s2179_s3 + $0x38] sm:$0xff] }
 0x340   : > { %747 = vperm.xlu0 %1552, %v1463_v10  }
 0x342   : > { %752 = vperm.xlu1 %1553, %v711_v14   ;;  %v1079_v14 = vld [vmem:[%s2179_s3 + $0x8] sm:$0xff] }
 0x346   : > { %742 = vperm.xlu1 %1553, %v701_v12  }
 0x3b1   : > { %v778_v0 = vpop.permute.xlu1 %777 }
 0x3b2   : > { %v1927_v20 = vsub.f32 %v1782_v53, %v778_v0  ;;  %v1930_v18 = vsub.f32 %v1784_v54, %v778_v0  ;;  %v1082_v0 = vld [vmem:[%s2179_s3 + $0x20] sm:$0xff] }
 0x3b3   : > { %v773_v21 = vpop.permute.xlu0 %772 }
 0x3b4   : > { %v1933_v22 = vsub.f32 %v1772_v46, %v773_v21  ;;  %v1936_v23 = vsub.f32 %v1774_v47, %v773_v21  ;;  %v810_v24 = vmul.f32 %v1927_v20, %v1927_v20  ;;  %v811_v25 = vmul.f32 %v1930_v18, %v1930_v18  ;;  %v1145_v21 = vld [vmem:[%s2180_s4 + $0x18] sm:$0xff] }
 0x3b5   : > { %v768_v26 = vpop.permute.xlu1 %767 }
 0x3b6   : > { %v1943_v53 = vsub.f32 %v1796_v62, %v768_v26  ;;  %v1946_v54 = vsub.f32 %v1788_v58, %v768_v26  ;;  %v833_v27 = vadd.f32 %v811_v25, %v810_v24  ;;  %v808_v46 = vmul.f32 %v1933_v22, %v1933_v22  ;;  %v1084_v24 = vld [vmem:[%s2179_s3 + $0x30] sm:$0xff]  ;;  %v1147_v25 = vld [vmem:[%s2180_s4 + $0x28] sm:$0xff]  ;;  %v1142_v26 = vld [vmem:[%s2180_s4] sm:$0xff] }
 0x3b7   : > { %v758_v28 = vpop.permute.xlu0 %757  ;;  %v809_v47 = vmul.f32 %v1936_v23, %v1936_v23 }
 0x3b8   : > { %v1953_v29 = vsub.f32 %v1780_v52, %v758_v28  ;;  %v1956_v31 = vsub.f32 %v1776_v49, %v758_v28  ;;  %834 = vadd.xlane.f32.xlu0 %v833_v27  ;;  %v806_v62 = vmul.f32 %v1943_v53, %v1943_v53  ;;  %v807_v58 = vmul.f32 %v1946_v54, %v1946_v54  ;;  %v1144_v27 = vld [vmem:[%s2180_s4 + $0x10] sm:$0xff] }
 0x3b9   : > { %v763_v32 = vpop.permute.xlu1 %762  ;;  %v830_v34 = vadd.f32 %v809_v47, %v808_v46  ;;  %v1146_v46 = vld [vmem:[%s2180_s4 + $0x20] sm:$0xff] }
 0x3ba   : > { %v1963_v35 = vsub.f32 %v1804_v4, %v763_v32  ;;  %v1966_v36 = vsub.f32 %v1798_v63, %v763_v32  ;;  %v827_v52 = vadd.f32 %v807_v58, %v806_v62  ;;  %v802_v49 = vmul.f32 %v1953_v29, %v1953_v29 }
 0x3bb   : > { %831 = vadd.xlane.f32.xlu1 %v830_v34  ;;  %v748_v37 = vpop.permute.xlu0 %747  ;;  %v803_v38 = vmul.f32 %v1956_v31, %v1956_v31 }
 0x3bc   : > { %v1973_v39 = vsub.f32 %v1794_v61, %v748_v37  ;;  %v1976_v40 = vsub.f32 %v1786_v57, %v748_v37  ;;  %828 = vadd.xlane.f32.xlu0 %v827_v52  ;;  %v804_v63 = vmul.f32 %v1963_v35, %v1963_v35  ;;  %v805_v4 = vmul.f32 %v1966_v36, %v1966_v36 }
 0x3bd   : > { %v753_v41 = vpop.permute.xlu1 %752  ;;  %v821_v42 = vadd.f32 %v803_v38, %v802_v49 }
 0x3be   : > { %v1983_v43 = vsub.f32 %v1810_v7, %v753_v41  ;;  %v1986_v44 = vsub.f32 %v1806_v5, %v753_v41  ;;  %v824_v61 = vadd.f32 %v805_v4, %v804_v63  ;;  %v798_v57 = vmul.f32 %v1973_v39, %v1973_v39 }
 0x3bf   : > { %822 = vadd.xlane.f32.xlu1 %v821_v42  ;;  %v799_v45 = vmul.f32 %v1976_v40, %v1976_v40 }
 0x3c0   : > { %825 = vadd.xlane.f32.xlu0 %v824_v61  ;;  %v800_v48 = vmul.f32 %v1983_v43, %v1983_v43  ;;  %v801_v50 = vmul.f32 %v1986_v44, %v1986_v44 }
 0x3c1   : > { %v743_v7 = vpop.permute.xlu1 %742  ;;  %v815_v51 = vadd.f32 %v799_v45, %v798_v57 }
 0x3c2   : > { %v1997_v5 = vsub.f32 %v1816_v11, %v743_v7  ;;  %v2000_v55 = vsub.f32 %v1812_v9, %v743_v7  ;;  %v818_v56 = vadd.f32 %v801_v50, %v800_v48  ;;  %v1081_v9 = vld [vmem:[%s2179_s3 + $0x18] sm:$0xff]  ;;  %v1083_v11 = vld [vmem:[%s2179_s3 + $0x28] sm:$0xff] }
 0x3c3   : > { %816 = vadd.xlane.f32.xlu1 %v815_v51 }
 0x3c4   : > { %819 = vadd.xlane.f32.xlu0 %v818_v56  ;;  %v796_v10 = vmul.f32 %v1997_v5, %v1997_v5  ;;  %v797_v12 = vmul.f32 %v2000_v55, %v2000_v55 }
 0x3c6   : > { %v812_v13 = vadd.f32 %v797_v12, %v796_v10 }
 0x3c8   : > { %813 = vadd.xlane.f32.xlu0 %v812_v13 }
 0x3d4   : > { %1093 = vperm.xlu1 %1553, %v1079_v14  }
 0x3d8   : > { %1103 = vperm.xlu1 %1553, %v1081_v9  }
 0x3dc   : > { %1113 = vperm.xlu1 %1553, %v1083_v11  }
 0x3de   : > { %1088 = vperm.xlu0 %1552, %v1078_v15  }
 0x3e0   : > { %1123 = vperm.xlu1 %1553, %v1085_v16  }
 0x3e2   : > { %1098 = vperm.xlu0 %1552, %v1080_v17  }
 0x3e4   : > { %1157 = vperm.xlu1 %1553, %v1143_v19  }
 0x3e6   : > { %1108 = vperm.xlu0 %1552, %v1082_v0  }
 0x3e8   : > { %1167 = vperm.xlu1 %1553, %v1145_v21  }
 0x3ea   : > { %1118 = vperm.xlu0 %1552, %v1084_v24  }
 0x3ec   : > { %1177 = vperm.xlu1 %1553, %v1147_v25  }
 0x3ee   : > { %1152 = vperm.xlu0 %1552, %v1142_v26  }
 0x3f2   : > { %1162 = vperm.xlu0 %1552, %v1144_v27  }
 0x3f6   : > { %1172 = vperm.xlu0 %1552, %v1146_v46  }
 0x441   : > { %v835_v28 = vpop.xlane.xlu0 %834 }
 0x442   : > { %1473 = vmatprep.subr.mxu1 %v835_v28 }
 0x443   : > { %1474 = vmatpush3.msra.mxu1 %v835_v28 }
 0x444   : > { %v832_v47 = vpop.xlane.xlu1 %831 }
 0x445   : > { %1475 = vmatprep.subr.mxu1 %v832_v47  ;;  %v829_v62 = vpop.xlane.xlu0 %828 }
 0x446   : > { %1476 = vmatpush3.msra.mxu1 %v832_v47 }
 0x447   : > { %1477 = vmatprep.subr.mxu1 %v829_v62 }
 0x448   : > { %1478 = vmatpush3.msra.mxu1 %v829_v62  ;;  %v823_v58 = vpop.xlane.xlu1 %822 }
 0x449   : > { %v826_v32 = vpop.xlane.xlu0 %825 }
 0x44a   : > { %1479 = vmatprep.subr.mxu1 %v826_v32 }
 0x44b   : > { %1480 = vmatpush3.msra.mxu1 %v826_v32 }
 0x44c   : > { %1481 = vmatprep.subr.mxu1 %v823_v58  ;;  %v817_v52 = vpop.xlane.xlu1 %816 }
 0x44d   : > { %1482 = vmatpush3.msra.mxu1 %v823_v58  ;;  %v820_v34 = vpop.xlane.xlu0 %819 }
 0x44e   : > { %1483 = vmatprep.subr.mxu1 %v820_v34 }
 0x44f   : > { %1484 = vmatpush3.msra.mxu1 %v820_v34 }
 0x450   : > { %1485 = vmatprep.subr.mxu1 %v817_v52  ;;  %v1094_v50 = vpop.permute.xlu1 %1093 }
 0x451   : > { %1486 = vmatpush3.msra.mxu1 %v817_v52  ;;  %v814_v49 = vpop.xlane.xlu0 %813 }
 0x452   : > { %1487 = vmatprep.subr.mxu1 %v814_v49 }
 0x453   : > { %1488 = vmatpush3.msra.mxu1 %v814_v49 }
 0x454   : > { %1490 = vmatmul.mubr.msk.f32.vlgmr.msra.gmra.mxu1 %vm525_vm5, %v1830_v30  ;;  %v1104_v51 = vpop.permute.xlu1 %1103 }
 0x455   : > { %1496 = vmatprep.mubr.msk.f32.mxu1 %vm610_vm14, %v1837_v33 }
 0x458   : > { %v2072_v10 = vpop.permute.xlu1 %1113 }
 0x45c   : > { %v2076_v13 = vpop.permute.xlu1 %1123 }
 0x460   : > { %v1158_v9 = vpop.permute.xlu1 %1157 }
 0x464   : > { %v1168_v15 = vpop.permute.xlu1 %1167 }
 0x468   : > { %v2078_v17 = vpop.permute.xlu1 %1177 }
 0x514   : > { %v1491_v37 = vpop.f32.mrf.mxu1 }
 0x515   : > { %v912_v38 = vmul.f32 0.0009765625, %v1491_v37 }
 0x516   : > { %v902_v63 = vpop.f32.mrf.mxu1 }
 0x517   : > { %v914_v4 = vadd.f32 1e-05, %v912_v38  ;;  %v911_v41 = vmul.f32 0.0009765625, %v902_v63 }
 0x519   : > { %1554 = vrsqrt.f32 %v914_v4  ;;  %v913_v42 = vadd.f32 1e-05, %v911_v41 }
 0x51b   : > { %1556 = vrsqrt.f32 %v913_v42 }
 0x526   : > { %v1555_v61 = vpop.eup %1554 }
 0x527   : > { %1492 = vmatprep.subr.mxu1 %v1555_v61 }
 0x528   : > { %v1557_v57 = vpop.eup %1556  ;;  %1493 = vmatpush3.msra.mxu1 %v1555_v61 }
 0x529   : > { %1494 = vmatprep.subr.mxu1 %v1557_v57 }
 0x52a   : > { %1495 = vmatpush3.msra.mxu1 %v1557_v57 }
 0x52b   : > { %1497 = vmatmul.mubr.msk.f32.vlgmr.msra.gmra.mxu1 %vm610_vm14, %v1878_v59 }
 0x52c   : > { %1499 = vmatprep.mubr.msk.f32.mxu1 %vm610_vm14, %v1883_v60 }
 0x52f   : > { %1500 = vmatmul.mubr.msk.f32.gmra.mxu1 %vm610_vm14, %v1892_v1 }
 0x530   : > { %1502 = vmatprep.mubr.msk.f32.mxu1 %vm610_vm14, %v1897_v2 }
 0x533   : > { %1503 = vmatmul.mubr.msk.f32.gmra.mxu1 %vm610_vm14, %v1906_v3  ;;  %v1148_v3 = vld [vmem:[%s2180_s4 + $0x30] sm:$0xff] }
 0x534   : > { %1505 = vmatprep.mubr.msk.f32.mxu1 %vm610_vm14, %v1911_v6  ;;  %v1149_v6 = vld [vmem:[%s2180_s4 + $0x38] sm:$0xff] }
 0x537   : > { %1506 = vmatmul.mubr.msk.f32.gmra.mxu1 %vm610_vm14, %v1920_v8  ;;  %v1089_v8 = vpop.permute.xlu0 %1088 }
 0x53b   : > { %v1099_v7 = vpop.permute.xlu0 %1098 }
 0x53f   : > { %v1109_v56 = vpop.permute.xlu0 %1108 }
 0x543   : > { %v2074_v12 = vpop.permute.xlu0 %1118 }
 0x547   : > { %v1153_v14 = vpop.permute.xlu0 %1152 }
 0x54b   : > { %v1163_v11 = vpop.permute.xlu0 %1162 }
 0x54f   : > { %v1173_v16 = vpop.permute.xlu0 %1172 }
 0x5eb   : > { %v1498_v30 = vpop.f32.mrf.mxu1 }
 0x5ec   : > { %1029 = vperm.xlu0 %1552, %v1498_v30  }
 0x5ed   : > { %v983_v33 = vpop.f32.mrf.mxu1 }
 0x5ee   : > { %1024 = vperm.xlu1 %1553, %v983_v33  }
 0x5ef   : > { %v1501_v59 = vpop.f32.mrf.mxu1 }
 0x5f1   : > { %v993_v60 = vpop.f32.mrf.mxu1 }
 0x5f2   : > { %1039 = vperm.xlu1 %1553, %v1501_v59  }
 0x5f3   : > { %v1504_v1 = vpop.f32.mrf.mxu1 }
 0x5f5   : > { %v1003_v45 = vpop.f32.mrf.mxu1 }
 0x5f6   : > { %1034 = vperm.xlu1 %1553, %v993_v60   ;;  %1044 = vperm.xlu0 %1552, %v1003_v45  }
 0x5f7   : > { %v1507_v2 = vpop.f32.mrf.mxu1 }
 0x5f9   : > { %v1013_v48 = vpop.f32.mrf.mxu1 }
 0x5fa   : > { %1049 = vperm.xlu1 %1553, %v1504_v1   ;;  %1054 = vperm.xlu0 %1552, %v1013_v48  }
 0x5fe   : > { %1059 = vperm.xlu1 %1553, %v1507_v2   ;;  %1182 = vperm.xlu0 %1552, %v1148_v3  }
 0x602   : > { %1187 = vperm.xlu1 %1553, %v1149_v6  }
 0x667   : > { %v1030_v19 = vpop.permute.xlu0 %1029 }
 0x668   : > { %v1064_v0 = vmul.f32 %v1030_v19, %v1973_v39  ;;  %v1065_v21 = vmul.f32 %v1030_v19, %v1976_v40 }
 0x669   : > { %v1025_v24 = vpop.permute.xlu1 %1024 }
 0x66a   : > { %v1128_v25 = vmul.f32 %v1094_v50, %v1064_v0  ;;  %v1129_v26 = vmul.f32 %v1094_v50, %v1065_v21  ;;  %v1062_v27 = vmul.f32 %v1025_v24, %v1997_v5  ;;  %v1063_v46 = vmul.f32 %v1025_v24, %v2000_v55 }
 0x66c   : > { %v1192_v28 = vadd.f32 %v1158_v9, %v1128_v25  ;;  %v1193_v47 = vadd.f32 %v1158_v9, %v1129_v26  ;;  %v1126_v62 = vmul.f32 %v1089_v8, %v1062_v27  ;;  %v1127_v58 = vmul.f32 %v1089_v8, %v1063_v46 }
 0x66d   : > { %v1040_v32 = vpop.permute.xlu1 %1039 }
 0x66e   : > { %vm1208_vm5 = vcmp.gt.f32.partialorder %v1192_v28, 0.0  ;;  %vm1209_vm14 = vcmp.gt.f32.partialorder %v1193_v47, 0.0  ;;  %v1224_v34 = vmul.f32 0.2, %v1192_v28  ;;  %v1225_v39 = vmul.f32 0.2, %v1193_v47 }
 0x66f   : > { %v1190_v52 = vadd.f32 %v1153_v14, %v1126_v62  ;;  %v1191_v40 = vadd.f32 %v1153_v14, %v1127_v58  ;;  %v1068_v49 = vmul.f32 %v1040_v32, %v1953_v29  ;;  %v1069_v37 = vmul.f32 %v1040_v32, %v1956_v31 }
 0x670   : > { %v1240_v38 = vsel %vm1208_vm5, %v1192_v28, %v1224_v34  ;;  %v1241_v63 = vsel %vm1209_vm14, %v1193_v47, %v1225_v39 }
 0x671   : > { %1256 = vst [vmem:[%s2089_s12 + $0x10] sm:$0xff] %v1240_v38  ;;  %1257 = vst [vmem:[%s2089_s12 + $0x18] sm:$0xff] %v1241_v63  ;;  %vm1206_vm15 = vcmp.gt.f32.partialorder %v1190_v52, 0.0  ;;  %vm1207_vm2 = vcmp.gt.f32.partialorder %v1191_v40, 0.0  ;;  %v1222_v5 = vmul.f32 0.2, %v1190_v52  ;;  %v1035_v4 = vpop.permute.xlu1 %1034  ;;  %v1045_v41 = vpop.permute.xlu0 %1044  ;;  %v1132_v42 = vmul.f32 %v1104_v51, %v1068_v49 }
 0x672   : > { %v1223_v55 = vmul.f32 0.2, %v1191_v40  ;;  %v1133_v29 = vmul.f32 %v1104_v51, %v1069_v37  ;;  %v1066_v31 = vmul.f32 %v1035_v4, %v1983_v43  ;;  %v1067_v61 = vmul.f32 %v1035_v4, %v1986_v44 }
 0x673   : > { %v1238_v57 = vsel %vm1206_vm15, %v1190_v52, %v1222_v5  ;;  %v1070_v33 = vmul.f32 %v1045_v41, %v1963_v35  ;;  %v1071_v59 = vmul.f32 %v1045_v41, %v1966_v36  ;;  %v1196_v60 = vadd.f32 %v1168_v15, %v1132_v42 }
 0x674   : > { %v1239_v30 = vsel %vm1207_vm2, %v1191_v40, %v1223_v55  ;;  %1254 = vst [vmem:[%s2089_s12] sm:$0xff] %v1238_v57  ;;  %v1197_v1 = vadd.f32 %v1168_v15, %v1133_v29  ;;  %v1130_v45 = vmul.f32 %v1099_v7, %v1066_v31  ;;  %v1131_v2 = vmul.f32 %v1099_v7, %v1067_v61 }
 0x675   : > { %1255 = vst [vmem:[%s2089_s12 + $0x8] sm:$0xff] %v1239_v30  ;;  %v1134_v48 = vmul.f32 %v1109_v56, %v1070_v33  ;;  %v1135_v3 = vmul.f32 %v1109_v56, %v1071_v59  ;;  %v1050_v6 = vpop.permute.xlu1 %1049  ;;  %vm1212_vm6 = vcmp.gt.f32.partialorder %v1196_v60, 0.0  ;;  %v1228_v43 = vmul.f32 0.2, %v1196_v60  ;;  %v1055_v36 = vpop.permute.xlu0 %1054 }
 0x676   : > { %vm1213_vm8 = vcmp.gt.f32.partialorder %v1197_v1, 0.0  ;;  %v1229_v44 = vmul.f32 0.2, %v1197_v1  ;;  %v1194_v8 = vadd.f32 %v1163_v11, %v1130_v45  ;;  %v1195_v50 = vadd.f32 %v1163_v11, %v1131_v2 }
 0x677   : > { %v1198_v35 = vadd.f32 %v1173_v16, %v1134_v48  ;;  %v1199_v51 = vadd.f32 %v1173_v16, %v1135_v3  ;;  %v1244_v14 = vsel %vm1212_vm6, %v1196_v60, %v1228_v43  ;;  %v1072_v15 = vmul.f32 %v1050_v6, %v1943_v53 }
 0x678   : > { %v1245_v9 = vsel %vm1213_vm8, %v1197_v1, %v1229_v44  ;;  %v1073_v7 = vmul.f32 %v1050_v6, %v1946_v54  ;;  %1260 = vst [vmem:[%s2089_s12 + $0x30] sm:$0xff] %v1244_v14  ;;  %vm1210_vm9 = vcmp.gt.f32.partialorder %v1194_v8, 0.0  ;;  %vm1211_vm10 = vcmp.gt.f32.partialorder %v1195_v50, 0.0 }
 0x679   : > { %1261 = vst [vmem:[%s2089_s12 + $0x38] sm:$0xff] %v1245_v9  ;;  %v1226_v56 = vmul.f32 0.2, %v1194_v8  ;;  %v1227_v19 = vmul.f32 0.2, %v1195_v50  ;;  %vm1214_vm11 = vcmp.gt.f32.partialorder %v1198_v35, 0.0  ;;  %v1060_v0 = vpop.permute.xlu1 %1059  ;;  %v1136_v53 = vmul.f32 %v2072_v10, %v1072_v15 }
 0x67a   : > { %vm1215_vm12 = vcmp.gt.f32.partialorder %v1199_v51, 0.0  ;;  %v1230_v11 = vmul.f32 0.2, %v1198_v35  ;;  %v1231_v16 = vmul.f32 0.2, %v1199_v51  ;;  %v1137_v54 = vmul.f32 %v2072_v10, %v1073_v7  ;;  %v1183_v10 = vpop.permute.xlu0 %1182 }
 0x67b   : > { %v1242_v21 = vsel %vm1210_vm9, %v1194_v8, %v1226_v56  ;;  %v1243_v24 = vsel %vm1211_vm10, %v1195_v50, %v1227_v19  ;;  %v1074_v27 = vmul.f32 %v1055_v36, %v1933_v22  ;;  %v1075_v46 = vmul.f32 %v1055_v36, %v1936_v23 }
 0x67c   : > { %1258 = vst [vmem:[%s2089_s12 + $0x20] sm:$0xff] %v1242_v21  ;;  %1259 = vst [vmem:[%s2089_s12 + $0x28] sm:$0xff] %v1243_v24  ;;  %v1246_v25 = vsel %vm1214_vm11, %v1198_v35, %v1230_v11  ;;  %v1247_v26 = vsel %vm1215_vm12, %v1199_v51, %v1231_v16  ;;  %v1200_v28 = vadd.f32 %v2078_v17, %v1136_v53 }
 0x67d   : > { %1262 = vst [vmem:[%s2089_s12 + $0x40] sm:$0xff] %v1246_v25  ;;  %1263 = vst [vmem:[%s2089_s12 + $0x48] sm:$0xff] %v1247_v26  ;;  %v1201_v47 = vadd.f32 %v2078_v17, %v1137_v54  ;;  %v1076_v62 = vmul.f32 %v1060_v0, %v1927_v20  ;;  %v1077_v58 = vmul.f32 %v1060_v0, %v1930_v18  ;;  %v1188_v18 = vpop.permute.xlu1 %1187 }
 0x67e   : > { %v1138_v32 = vmul.f32 %v2074_v12, %v1074_v27  ;;  %v1139_v22 = vmul.f32 %v2074_v12, %v1075_v46  ;;  %vm1216_vm13 = vcmp.gt.f32.partialorder %v1200_v28, 0.0  ;;  %v1232_v23 = vmul.f32 0.2, %v1200_v28 }
 0x67f   : > { %vm1217_vm0 = vcmp.gt.f32.partialorder %v1201_v47, 0.0  ;;  %v1233_v34 = vmul.f32 0.2, %v1201_v47  ;;  %v1140_v17 = vmul.f32 %v2076_v13, %v1076_v62  ;;  %v1141_v20 = vmul.f32 %v2076_v13, %v1077_v58 }
 0x680   : > { %v1202_v39 = vadd.f32 %v1183_v10, %v1138_v32  ;;  %v1203_v52 = vadd.f32 %v1183_v10, %v1139_v22  ;;  %v1248_v40 = vsel %vm1216_vm13, %v1200_v28, %v1232_v23 }
 0x681   : > { %v1249_v49 = vsel %vm1217_vm0, %v1201_v47, %v1233_v34  ;;  %1264 = vst [vmem:[%s2089_s12 + $0x50] sm:$0xff] %v1248_v40  ;;  %v1204_v38 = vadd.f32 %v1188_v18, %v1140_v17  ;;  %v1205_v63 = vadd.f32 %v1188_v18, %v1141_v20 }
 0x682   : > { %1265 = vst [vmem:[%s2089_s12 + $0x58] sm:$0xff] %v1249_v49  ;;  %vm1218_vm1 = vcmp.gt.f32.partialorder %v1202_v39, 0.0  ;;  %vm1219_vm3 = vcmp.gt.f32.partialorder %v1203_v52, 0.0  ;;  %v1234_v12 = vmul.f32 0.2, %v1202_v39 }
 0x683   : > { %v1235_v37 = vmul.f32 0.2, %v1203_v52  ;;  %vm1220_vm4 = vcmp.gt.f32.partialorder %v1204_v38, 0.0  ;;  %vm1221_vm7 = vcmp.gt.f32.partialorder %v1205_v63, 0.0  ;;  %v1236_v55 = vmul.f32 0.2, %v1204_v38 }
 0x684   : > { %v1250_v5 = vsel %vm1218_vm1, %v1202_v39, %v1234_v12  ;;  %v1237_v4 = vmul.f32 0.2, %v1205_v63 }
 0x685   : > { %v1251_v13 = vsel %vm1219_vm3, %v1203_v52, %v1235_v37  ;;  %1266 = vst [vmem:[%s2089_s12 + $0x60] sm:$0xff] %v1250_v5  ;;  %v1252_v41 = vsel %vm1220_vm4, %v1204_v38, %v1236_v55 }
 0x686   : > { %1267 = vst [vmem:[%s2089_s12 + $0x68] sm:$0xff] %v1251_v13  ;;  %v1253_v42 = vsel %vm1221_vm7, %v1205_v63, %v1237_v4  ;;  %1268 = vst [vmem:[%s2089_s12 + $0x70] sm:$0xff] %v1252_v41 }
 0x687   : > { %1269 = vst [vmem:[%s2089_s12 + $0x78] sm:$0xff] %v1253_v42 }
 0x688   : > { %1571 = shalt.err (!%p1568_p3)
}
 0x689   : > { %s1572_s6 = scalar_lea.hbm %s2128_s16, 2048  ;;  %s1576_s9 = scalar_lea.hbm %s2181_s5, 4096 }
 0x68a   : > { %p1573_p4 = scmp.ne.s32.totalorder %s2128_s16, %s1572_s6  ;;  %p1577_p9 = scmp.lt.s32.totalorder %s2128_s16, %s2181_s5 }
 0x68b   : > { %p1578_p10 = scmp.lt.s32.totalorder %s1576_s9, %s1572_s6 }
 0x68c   : > { %p1574_p7 = pnand %p1573_p4, %p1693_p5 }
 0x68d   : > { %p1579_p11 = por %p1578_p10, %p1577_p9 }
 0x68e   : > { %p1575_p8 = pneg %p1574_p7 }
 0x690   : > { %p1580_p12 = pnand %p1579_p11, %p1575_p8 }
 0x692   : > { %1583 = shalt.err (!%p1580_p12)
}
 0x693   : > { %s1623_s12 = smov 256   ;;  %s1624_s13 = smov 16  }
 0x694   : > { %1509 = dma.vmem_to_hbm [thread:$0]  (%p1693_p5), %s2130_s14, 2048, %s2128_s16, %s2136_s17, %s1623_s12, %s1623_s12, %s1624_s13  }
 0x695 PF: > { %p1515_p13 = scmp.ge.s32.totalorder %s1618_s21, 2  ;;  %s1299_s22 = sand.u32 1, %s1606_s18  }
 0x696   : > { %s1300_s15 = scalar_lea.sflag [#allocation3], %s1299_s22 }
 0x697   : > { %p1512_p0 = pnand %p1515_p13, %p1697_p6 }
 0x699   : > { %p1513_p1 = pneg %p1512_p0 }
 0x69b   : > { %1601 = dma.done.wait (%p1513_p1), %s1300_s15, 2048  }
 0x69c   : > { %1603 = vsyncadd (%p1513_p1), %s1300_s15, 4294965248  ;;  %p15_p2 = scmp.ge.s32.totalorder %s1680_s24, 4   ;;  %s2198_s18 = smov %s1610_s19 }
 0x69d   : > { %s2199_s19 = smov %s1614_s20  ;;  %s2200_s20 = smov %s1691_s27 }
 0x69e   : > { %s2201_s21 = smov %s1680_s24  ;;  %17 = sbr.rel (!%p15_p2) target bundleno = 3 (0x3), region = 75 }
 0x6a3   :  { %1305 = vsyncpa [#allocation3], 1 }
 0x6a4   :  { %1307 = vsyncpa [#allocation3 + $0x1], 1 }

</bundles_post_ra>
